<compile_context>
chip_gen: v5e
topology: v5e:2x2
jax: 0.10.0
libtpu: 0.0.40
codegen_flags: <defaults>
</compile_context>

<pallas_src>
import jax
import jax.numpy as jnp
from jax import lax
from jax.experimental import pallas as pl
from jax.experimental.pallas import tpu as pltpu


# ---------------------------------------------------------------------------
# Kernels
# ---------------------------------------------------------------------------
def _softdot_core(target, ctx, mask_vals=None):
    """target: (TB, cd); ctx: (TB, S, cd); mask_vals: optional (TB, S) int8.
    Returns (wctx (TB, cd) f32, attn (TB, S) f32)."""
    # scores[b, s] = <ctx[b, s, :], target[b, :]>
    # VPU multiply (native dtype) + XLU lane reduce in f32 — no per-row MXU
    # matvecs, stays hidden under the context HBM stream.
    prod = ctx * target[:, None, :]                             # (TB, S, cd)
    scores = jnp.sum(prod.astype(jnp.float32), axis=-1)         # (TB, S) f32

    if mask_vals is not None:
        # masked_fill_(mask, -inf); fully-masked rows -> NaN (same as torch
        # softmax over all -inf).
        keep_inf = mask_vals.astype(jnp.int32) != 0
        scores = jnp.where(keep_inf, -jnp.inf, scores)

    # Softmax over the sequence axis, in f32.
    m = jnp.max(scores, axis=1, keepdims=True)
    e = jnp.exp(scores - m)
    denom = jnp.sum(e, axis=1, keepdims=True)
    attn = e * pl.reciprocal(denom, approx=False)                # EUP, not VPU div

    # wctx[b, :] = sum_s attn[b, s] * ctx[b, s, :]
    # VPU multiply + XLU sublane reduce in f32.
    wprod = ctx * attn.astype(ctx.dtype)[:, :, None]             # (TB, S, cd)
    wctx = jnp.sum(wprod.astype(jnp.float32), axis=1)            # (TB, cd) f32
    return wctx, attn


def _softdot_kernel_nomask(target_ref, ctx_ref, wctx_ref, attn_ref):
    wctx, attn = _softdot_core(target_ref[...], ctx_ref[...])
    wctx_ref[...] = wctx.astype(wctx_ref.dtype)
    attn_ref[...] = attn.astype(attn_ref.dtype)


def _softdot_kernel_mask(target_ref, ctx_ref, mask_ref, wctx_ref, attn_ref):
    wctx, attn = _softdot_core(target_ref[...], ctx_ref[...], mask_ref[...])
    wctx_ref[...] = wctx.astype(wctx_ref.dtype)
    attn_ref[...] = attn.astype(attn_ref.dtype)


# ---------------------------------------------------------------------------
# Tiling / VMEM accounting (generation-aware)
# ---------------------------------------------------------------------------
def _round_up(x, m):
    return ((x + m - 1) // m) * m


def _vmem_capacity_bytes():
    try:
        info = pltpu.get_tpu_info()
        cap = getattr(info, "vmem_capacity_bytes", None)
        if cap:
            return int(cap)
    except Exception:
        pass
    return 64 << 20  # conservative fallback: v7x per-TC VMEM


def _vmem_budget():
    """Returns (vmem_limit_bytes, usable_bytes_for_pipeline_tiles)."""
    cap = _vmem_capacity_bytes()
    if cap >= (96 << 20):        # 128 MiB parts (v5e / v6e): raise scoped limit
        limit = 96 << 20
    else:                        # v7x: 64 MiB per TC
        limit = 48 << 20
    headroom = 10 << 20          # compiler internal scratch / relayout buffers
    return limit, limit - headroom


def _choose_batch_tile(B, S, cd, ctx_item, out_item, has_mask, gran):
    """Pick (batch_tile, padded_batch).  Tile is a multiple of `gran`, sized by
    explicit per-row VMEM accounting, and kept small enough that the grid has
    depth >= 4 (>= 2 for small batches) for pipelining / megacore sharding."""
    _, usable = _vmem_budget()
    # Per-batch-row footprint of one pipeline stage: double-buffered ctx tile,
    # f32 (S, cd) elementwise temporaries of the VPU/XLU contraction
    # formulation, target / mask / outputs (double-buffered), f32 row vectors.
    per_row = (2 * S * cd * ctx_item          # ctx tile, 2 buffers
               + 2 * S * cd * 4               # f32 product temporaries
               + 2 * cd * ctx_item            # target tile, 2 buffers
               + 2 * (cd + S) * out_item      # outputs, 2 buffers
               + 2 * (cd + S) * 4)            # f32 scores / attn / wctx
    if has_mask:
        per_row += 2 * S                      # int8 mask, 2 buffers
    cap_rows = max(gran, (usable // per_row) // gran * gran)

    bp_min = _round_up(B, gran)
    tb = min(cap_rows, 1024, bp_min)
    # Keep grid depth >= 4 (>= 2 for small batches) so the "parallel" batch
    # axis pipelines and shards across TensorCores (v7x has 2 TCs/chip).
    if bp_min >= 4 * gran:
        tb = min(tb, _round_up(pl.cdiv(bp_min, 4), gran))
    elif bp_min >= 2 * gran:
        tb = min(tb, _round_up(pl.cdiv(bp_min, 2), gran))
    tb = max(gran, tb)
    bp = _round_up(B, tb)
    return tb, bp


# ---------------------------------------------------------------------------
# Wrapper
# ---------------------------------------------------------------------------
def context_only_soft_dot_attention(h, context, linear_in_weight, mask=None):
    """h: (B, dim); context: (B, S, context_dim);
    linear_in_weight: (context_dim, dim)  (PyTorch nn.Linear layout);
    mask: optional (B, S) bool/int, True/nonzero entries masked to -inf.
    Returns (weighted_context (B, context_dim), attn (B, S))."""
    B, dim = h.shape
    Bc, S, cd = context.shape
    assert Bc == B
    assert linear_in_weight.shape == (cd, dim)

    out_dtype = context.dtype
    ctx_item = jnp.dtype(context.dtype).itemsize
    out_item = jnp.dtype(out_dtype).itemsize

    # Input projection: tiny B x dim x cd matmul, run once in the wrapper on
    # the MXU (contracts h's dim axis with the weight's dim axis -> no
    # transpose pass over the weight, nothing repeated per grid step).
    target = lax.dot_general(
        h, linear_in_weight, (((1,), (1,)), ((), ())),
        preferred_element_type=jnp.float32).astype(context.dtype)

    # Batch-axis granularity: f32 wants 8 sublanes, 16-bit types 16, and the
    # int8 mask 32 (sublane packing).
    gran = 8
    if ctx_item == 2 or jnp.dtype(target.dtype).itemsize == 2:
        gran = 16
    if mask is not None:
        gran = 32

    TB, Bp = _choose_batch_tile(B, S, cd, ctx_item, out_item, mask is not None, gran)
    grid = (Bp // TB,)

    mask_i8 = None
    if mask is not None:
        mask_i8 = mask.astype(jnp.int8)         # 4x less HBM traffic than int32

    if Bp != B:
        pad = Bp - B
        # Zero padding: padded rows give all-zero scores -> finite uniform
        # softmax -> zero wctx; sliced off below.  Mask padded with 0 (=keep).
        target = jnp.pad(target, ((0, pad), (0, 0)))
        context = jnp.pad(context, ((0, pad), (0, 0), (0, 0)))
        if mask_i8 is not None:
            mask_i8 = jnp.pad(mask_i8, ((0, pad), (0, 0)))

    out_shape = (
        jax.ShapeDtypeStruct((Bp, cd), out_dtype),   # weighted_context
        jax.ShapeDtypeStruct((Bp, S), out_dtype),    # attn
    )

    tgt_spec = pl.BlockSpec((TB, cd), lambda b: (b, 0))
    ctx_spec = pl.BlockSpec((TB, S, cd), lambda b: (b, 0, 0))
    out_specs = (
        pl.BlockSpec((TB, cd), lambda b: (b, 0)),
        pl.BlockSpec((TB, S), lambda b: (b, 0)),
    )

    # Advisory cost: two mul+reduce contractions + softmax; mem-bound on ctx.
    flops = 4 * Bp * S * cd + 5 * Bp * S
    bytes_accessed = (
        target.size * ctx_item
        + context.size * ctx_item
        + Bp * cd * out_item
        + Bp * S * out_item
    )
    if mask_i8 is not None:
        bytes_accessed += Bp * S
    cost = pl.CostEstimate(
        flops=flops, transcendentals=Bp * S + Bp, bytes_accessed=bytes_accessed)

    vmem_limit, _ = _vmem_budget()
    cparams = pltpu.CompilerParams(
        dimension_semantics=("parallel",),      # shard batch tiles across TCs
        vmem_limit_bytes=vmem_limit,
    )

    if mask_i8 is None:
        wctx, attn = pl.pallas_call(
            _softdot_kernel_nomask,
            out_shape=out_shape,
            grid=grid,
            in_specs=[tgt_spec, ctx_spec],
            out_specs=out_specs,
            compiler_params=cparams,
            cost_estimate=cost,
        )(target, context)
    else:
        mask_spec = pl.BlockSpec((TB, S), lambda b: (b, 0))
        wctx, attn = pl.pallas_call(
            _softdot_kernel_mask,
            out_shape=out_shape,
            grid=grid,
            in_specs=[tgt_spec, ctx_spec, mask_spec],
            out_specs=out_specs,
            compiler_params=cparams,
            cost_estimate=cost,
        )(target, context, mask_i8)

    if Bp != B:
        wctx = wctx[:B]
        attn = attn[:B]
    return wctx, attn


# ---------------------------------------------------------------------------
# Reference + test
# ---------------------------------------------------------------------------
def _reference(h, context, linear_in_weight, mask=None):
    target = h @ linear_in_weight.T                       # (B, cd)
    scores = jnp.einsum("bsd,bd->bs", context, target)    # (B, S)
    if mask is not None:
        scores = jnp.where(mask, -jnp.inf, scores)
    attn = jax.nn.softmax(scores, axis=1)
    wctx = jnp.einsum("bs,bsd->bd", attn, context)
    return wctx, attn


if __name__ == "__main__":
    key = jax.random.PRNGKey(0)
    k_h, k_ctx, k_w, k_m = jax.random.split(key, 4)

    B, dim, context_dim, S = 2, 32, 64, 8

    h = jax.random.normal(k_h, (B, dim), dtype=jnp.float32)
    context = jax.random.normal(k_ctx, (B, S, context_dim), dtype=jnp.float32)
    # nn.Linear(dim, context_dim, bias=False) weight in PyTorch layout.
    linear_in_weight = (
        jax.random.normal(k_w, (context_dim, dim), dtype=jnp.float32) * 0.1
    )
    # Mask with a few masked positions (never a fully-masked row).
    mask = jax.random.bernoulli(k_m, p=0.25, shape=(B, S))
    mask = mask.at[:, 0].set(False)

    # Masked path.
    wctx, attn = context_only_soft_dot_attention(h, context, linear_in_weight, mask)
    jax.block_until_ready((wctx, attn))
    wctx_ref, attn_ref = _reference(h, context, linear_in_weight, mask)
    assert jnp.allclose(wctx, wctx_ref, atol=2e-5, rtol=2e-5)
    assert jnp.allclose(attn, attn_ref, atol=2e-5, rtol=2e-5)

    # Unmasked (specialized) path.
    wctx2, attn2 = context_only_soft_dot_attention(h, context, linear_in_weight, None)
    jax.block_until_ready((wctx2, attn2))
    wctx2_ref, attn2_ref = _reference(h, context, linear_in_weight, None)
    assert jnp.allclose(wctx2, wctx2_ref, atol=2e-5, rtol=2e-5)
    assert jnp.allclose(attn2, attn2_ref, atol=2e-5, rtol=2e-5)

    print("KERNEL_OK")
</pallas_src>

<mosaic_0001>
module attributes {stable_mosaic.version = 11 : i64} {
  func.func @_softdot_kernel_mask(%arg0: i32, %arg1: memref<32x64xf32, #tpu.memory_space<vmem>>, %arg2: memref<32x8x64xf32, #tpu.memory_space<vmem>>, %arg3: memref<32x8xi8, #tpu.memory_space<vmem>>, %arg4: memref<32x64xf32, #tpu.memory_space<vmem>>, %arg5: memref<32x8xf32, #tpu.memory_space<vmem>>) attributes {dimension_semantics = [#tpu.dimension_semantics<parallel>], iteration_bounds = array<i64: 1>, scalar_prefetch = 0 : i64, scratch_operands = 0 : i64, tpu.core_type = #tpu.core_type<tc>, window_params = [{transform_indices = @transform_0, window_bounds = array<i64: 32, 64>}, {transform_indices = @transform_1, window_bounds = array<i64: 32, 8, 64>}, {transform_indices = @transform_2, window_bounds = array<i64: 32, 8>}, {transform_indices = @transform_3, window_bounds = array<i64: 32, 64>}, {transform_indices = @transform_4, window_bounds = array<i64: 32, 8>}]} {
    %c0 = arith.constant 0 : index
    %c0_0 = arith.constant 0 : index
    %0 = vector.load %arg1[%c0, %c0_0] : memref<32x64xf32, #tpu.memory_space<vmem>>, vector<32x64xf32>
    %c0_1 = arith.constant 0 : index
    %c0_2 = arith.constant 0 : index
    %c0_3 = arith.constant 0 : index
    %1 = vector.load %arg2[%c0_1, %c0_2, %c0_3] : memref<32x8x64xf32, #tpu.memory_space<vmem>>, vector<32x8x64xf32>
    %c0_4 = arith.constant 0 : index
    %c0_5 = arith.constant 0 : index
    %2 = vector.load %arg3[%c0_4, %c0_5] : memref<32x8xi8, #tpu.memory_space<vmem>>, vector<32x8xi8>
    %3 = vector.shape_cast %0 : vector<32x64xf32> to vector<32x1x64xf32>
    %4 = vector.broadcast %3 : vector<32x1x64xf32> to vector<32x8x64xf32>
    %5 = arith.mulf %1, %4 : vector<32x8x64xf32>
    %cst = arith.constant dense<0.000000e+00> : vector<32x8xf32>
    %6 = vector.multi_reduction <add>, %5, %cst [2] : vector<32x8x64xf32> to vector<32x8xf32>
    %7 = arith.extsi %2 : vector<32x8xi8> to vector<32x8xi32>
    %c0_i32 = arith.constant 0 : i32
    %8 = vector.broadcast %c0_i32 : i32 to vector<32x8xi32>
    %9 = arith.cmpi ne, %7, %8 : vector<32x8xi32>
    %cst_6 = arith.constant 0xFF800000 : f32
    %10 = vector.broadcast %cst_6 : f32 to vector<32x8xf32>
    %11 = arith.select %9, %10, %6 : vector<32x8xi1>, vector<32x8xf32>
    %cst_7 = arith.constant dense<0xFF800000> : vector<32xf32>
    %12 = vector.multi_reduction <maximumf>, %11, %cst_7 [1] : vector<32x8xf32> to vector<32xf32>
    %13 = vector.shape_cast %12 : vector<32xf32> to vector<32x1xf32>
    %14 = vector.broadcast %13 : vector<32x1xf32> to vector<32x8xf32>
    %15 = arith.subf %11, %14 : vector<32x8xf32>
    %16 = math.exp %15 : vector<32x8xf32>
    %cst_8 = arith.constant dense<0.000000e+00> : vector<32xf32>
    %17 = vector.multi_reduction <add>, %16, %cst_8 [1] : vector<32x8xf32> to vector<32xf32>
    %18 = vector.shape_cast %17 : vector<32xf32> to vector<32x1xf32>
    %19 = tpu.reciprocal %18 : vector<32x1xf32> -> vector<32x1xf32>
    %20 = vector.broadcast %19 : vector<32x1xf32> to vector<32x8xf32>
    %21 = arith.mulf %16, %20 : vector<32x8xf32>
    %22 = vector.shape_cast %21 : vector<32x8xf32> to vector<32x8x1xf32>
    %23 = vector.broadcast %22 : vector<32x8x1xf32> to vector<32x8x64xf32>
    %24 = arith.mulf %1, %23 : vector<32x8x64xf32>
    %cst_9 = arith.constant dense<0.000000e+00> : vector<32x64xf32>
    %25 = vector.multi_reduction <add>, %24, %cst_9 [1] : vector<32x8x64xf32> to vector<32x64xf32>
    %c0_10 = arith.constant 0 : index
    %c0_11 = arith.constant 0 : index
    %26 = vector.load %arg4[%c0_10, %c0_11] : memref<32x64xf32, #tpu.memory_space<vmem>>, vector<32x64xf32>
    tpu.vector_store %arg4[%c0_10, %c0_11], %25 {strides = array<i32>} : memref<32x64xf32, #tpu.memory_space<vmem>>, vector<32x64xf32>,
    %c0_12 = arith.constant 0 : index
    %c0_13 = arith.constant 0 : index
    %27 = vector.load %arg5[%c0_12, %c0_13] : memref<32x8xf32, #tpu.memory_space<vmem>>, vector<32x8xf32>
    tpu.vector_store %arg5[%c0_12, %c0_13], %21 {strides = array<i32>} : memref<32x8xf32, #tpu.memory_space<vmem>>, vector<32x8xf32>,
    return
  }
  func.func @transform_0(%arg0: i32) -> (i32, i32) {
    %c0_i32 = arith.constant 0 : i32
    %c0_i32_0 = arith.constant 0 : i32
    return %arg0, %c0_i32 : i32, i32
  }
  func.func @transform_1(%arg0: i32) -> (i32, i32, i32) {
    %c0_i32 = arith.constant 0 : i32
    %c0_i32_0 = arith.constant 0 : i32
    %c0_i32_1 = arith.constant 0 : i32
    return %arg0, %c0_i32, %c0_i32_0 : i32, i32, i32
  }
  func.func @transform_2(%arg0: i32) -> (i32, i32) {
    %c0_i32 = arith.constant 0 : i32
    %c0_i32_0 = arith.constant 0 : i32
    return %arg0, %c0_i32 : i32, i32
  }
  func.func @transform_3(%arg0: i32) -> (i32, i32) {
    %c0_i32 = arith.constant 0 : i32
    %c0_i32_0 = arith.constant 0 : i32
    return %arg0, %c0_i32 : i32, i32
  }
  func.func @transform_4(%arg0: i32) -> (i32, i32) {
    %c0_i32 = arith.constant 0 : i32
    %c0_i32_0 = arith.constant 0 : i32
    return %arg0, %c0_i32 : i32, i32
  }
}

</mosaic_0001>

<bundles_post_ra>
// kernel: tpu_custom_call.1
= control target key start
LH: loop header
LB: loop body
LE: loop exit
PB: predicated region body
PF: predicated region fallthrough
CT: control target
= control target key end

     0   :  { %10 = vsyncpa [#allocation3], 0  ;;  %s1550_s0 = inlined_call_operand.hbm [shape: f32[32,64], index: 0, kind: input, shape index: {}]   ;;  %s1551_s1 = inlined_call_operand.hbm [shape: f32[32,8,64], index: 1, kind: input, shape index: {}]   ;;  %s1552_s2 = inlined_call_operand.vmem [shape: s8[32,8], index: 2, kind: input, shape index: {}]   ;;  %s1553_s3 = inlined_call_operand.hbm [shape: f32[32,64], index: 3, kind: output, shape index: {0}]   ;;  %s1554_s4 = inlined_call_operand.vmem [shape: f32[32,8], index: 4, kind: output, shape index: {1}]  }
   0x1   :  { %11 = vsyncpa [#allocation6], 0 }
   0x2   :  { %12 = vsyncpa [#allocation4], 0  ;;  %s17_s17 = sshll.u32 %s1550_s0, 4  ;;  %s1234_s18 = smov [#allocation2]   ;;  %s18_s17 = int_to_ptr.hbm [resolvable:$true] %s17_s17 }
   0x3   :  { %s19_s19 = sshll.u32 %s1234_s18, 4  ;;  %s30_s22 = sshll.u32 %s1551_s1, 4  ;;  %s20_s19 = int_to_ptr.vmem [resolvable:$true] %s19_s19  ;;  %s31_s22 = int_to_ptr.hbm [resolvable:$true] %s30_s22 }
   0x4   :  { %s1235_s23 = smov 128   ;;  %s1236_s24 = smov 8  }
   0x5   :  { %25 = dma.hbm_to_vmem [thread:$0]  %s18_s17, 512, %s20_s19, [#allocation3], %s1235_s23, %s1235_s23, %s1236_s24  }
   0x6   :  { %s1237_s25 = smov [#allocation5]  }
   0x7   :  { %s32_s26 = sshll.u32 %s1237_s25, 4  ;;  %s33_s26 = int_to_ptr.vmem [resolvable:$true] %s32_s26 }
   0x8   :  { %38 = dma.hbm_to_vmem [thread:$0]  %s31_s22, 4096, %s33_s26, [#allocation6], %s1235_s23, %s1235_s23, %s1236_s24  }
   0x9   :  { %1228 = dma.done.wait [#allocation3], 512  }
   0xa   :  { %1229 = vsyncadd [#allocation3], 4294966784 }
   0xb   :  { %1230 = dma.done.wait [#allocation6], 4096  }
   0xc   :  { %1231 = vsyncadd [#allocation6], 4294963200  ;;  %v49_v0 = vld [vmem:[#allocation2] sm:$0xff]  ;;  %vm217_vm0 = vcmask 523264   ;;  %v1280_v7 = vld [vmem:[#allocation5 + $0x10] sm:$0xff]  ;;  %vm388_vm1 = vcmask 1041409  }
   0xd   :  { %v1276_v1 = vld [vmem:[#allocation5] sm:$0xff]  ;;  %v121_v2 = vperm.slane %v49_v0, 0  ;;  %v96_v3 = vrot.slane %v49_v0, 4  ;;  %v94_v4 = vrot.slane %v49_v0, 2  ;;  %v93_v5 = vrot.slane %v49_v0, 1  ;;  %v1283_v14 = vld [vmem:[#allocation5 + $0x8] sm:$0xff] }
   0xe   :  { %v1278_v6 = vld [vmem:[#allocation5 + $0x20] sm:$0xff]  ;;  %v97_v8 = vrot.slane %v49_v0, 5  ;;  %v95_v9 = vrot.slane %v49_v0, 3  ;;  %v1288_v20 = vld [vmem:[#allocation5 + $0x28] sm:$0xff]  ;;  %v1290_v21 = vld [vmem:[#allocation5 + $0x18] sm:$0xff]  ;;  %v98_v25 = vrot.slane %v49_v0, 6 }
   0xf   :  { %v185_v10 = vmul.f32 %v121_v2, %v1276_v1  ;;  %v125_v11 = vperm.slane %v96_v3, 0  ;;  %v123_v12 = vperm.slane %v94_v4, 0  ;;  %v122_v13 = vperm.slane %v93_v5, 0  ;;  %v50_v29 = vld [vmem:[#allocation2 + $0x8] sm:$0xff]  ;;  %v1298_v32 = vld [vmem:[#allocation5 + $0x30] sm:$0xff]  ;;  %v61_v37 = vld [vmem:[#allocation5 + $0x40] sm:$0xff] }
  0x10   :  { %v126_v15 = vperm.slane %v97_v8, 0  ;;  %v124_v19 = vperm.slane %v95_v9, 0  ;;  %v99_v28 = vrot.slane %v49_v0, 7  ;;  %v127_v31 = vperm.slane %v98_v25, 0  ;;  %v1302_v38 = vld [vmem:[#allocation5 + $0x38] sm:$0xff]  ;;  %v1307_v47 = vld [vmem:[#allocation5 + $0x48] sm:$0xff] }
  0x11   :  { %v218_v16 = vsel %vm217_vm0, %v185_v10, 0.0  ;;  %v189_v17 = vmul.f32 %v125_v11, %v1278_v6  ;;  %v187_v18 = vmul.f32 %v123_v12, %v1280_v7  ;;  %v186_v24 = vmul.f32 %v122_v13, %v1283_v14  ;;  %v64_v52 = vld [vmem:[#allocation5 + $0x58] sm:$0xff]  ;;  %v1311_v53 = vld [vmem:[#allocation5 + $0x50] sm:$0xff]  ;;  %v1316_v62 = vld [vmem:[#allocation5 + $0x60] sm:$0xff]  ;;  %s1086_s11 = sshll.u32 %s1553_s3, 4  ;;  %s1087_s11 = int_to_ptr.hbm [resolvable:$true] %s1086_s11 }
  0x12   :  { %219 = vadd.xlane.f32.xlu0 %v218_v16  ;;  %v190_v26 = vmul.f32 %v126_v15, %v1288_v20  ;;  %v188_v27 = vmul.f32 %v124_v19, %v1290_v21  ;;  %v129_v35 = vperm.slane %v50_v29, 0  ;;  %v128_v36 = vperm.slane %v99_v28, 0  ;;  %v67_v4 = vld [vmem:[#allocation5 + $0x70] sm:$0xff]  ;;  %v1320_v5 = vld [vmem:[#allocation5 + $0x68] sm:$0xff]  ;;  %v69_v25 = vld [vmem:[#allocation5 + $0x80] sm:$0xff] }
  0x13   :  { %v230_v22 = vsel %vm217_vm0, %v189_v17, 0.0  ;;  %v224_v23 = vsel %vm217_vm0, %v187_v18, 0.0  ;;  %v221_v30 = vsel %vm217_vm0, %v186_v24, 0.0  ;;  %v191_v39 = vmul.f32 %v127_v31, %v1298_v32  ;;  %v51_v8 = vld [vmem:[#allocation2 + $0x10] sm:$0xff]  ;;  %v68_v17 = vld [vmem:[#allocation5 + $0x78] sm:$0xff]  ;;  %v70_v24 = vld [vmem:[#allocation5 + $0x88] sm:$0xff] }
  0x14   :  { %231 = vadd.xlane.f32.xlu2 %v230_v22  ;;  %225 = vadd.xlane.f32.xlu1 %v224_v23  ;;  %v233_v33 = vsel %vm217_vm0, %v190_v26, 0.0  ;;  %v227_v34 = vsel %vm217_vm0, %v188_v27, 0.0  ;;  %v100_v40 = vrot.slane %v50_v29, 1  ;;  %v193_v41 = vmul.f32 %v129_v35, %v61_v37  ;;  %v71_v35 = vld [vmem:[#allocation5 + $0x90] sm:$0xff] }
  0x15   :  { %v192_v42 = vmul.f32 %v128_v36, %v1302_v38  ;;  %v102_v43 = vrot.slane %v50_v29, 3  ;;  %v101_v44 = vrot.slane %v50_v29, 2  ;;  %v236_v45 = vsel %vm217_vm0, %v191_v39, 0.0 }
  0x16   :  { %v130_v46 = vperm.slane %v100_v40, 0  ;;  %v242_v48 = vsel %vm217_vm0, %v193_v41, 0.0  ;;  %v103_v55 = vrot.slane %v50_v29, 4  ;;  %v105_v58 = vrot.slane %v50_v29, 6  ;;  %v72_v41 = vld [vmem:[#allocation5 + $0x98] sm:$0xff] }
  0x17   :  { %v239_v49 = vsel %vm217_vm0, %v192_v42, 0.0  ;;  %v132_v50 = vperm.slane %v102_v43, 0  ;;  %v131_v51 = vperm.slane %v101_v44, 0  ;;  %v104_v59 = vrot.slane %v50_v29, 5  ;;  %v73_v42 = vld [vmem:[#allocation5 + $0xa0] sm:$0xff] }
  0x18   :  { %v194_v54 = vmul.f32 %v130_v46, %v1307_v47  ;;  %v133_v61 = vperm.slane %v103_v55, 0  ;;  %v135_v2 = vperm.slane %v105_v58, 0  ;;  %v106_v10 = vrot.slane %v50_v29, 7  ;;  %v75_v58 = vld [vmem:[#allocation5 + $0xb0] sm:$0xff] }
  0x19   :  { %v196_v56 = vmul.f32 %v132_v50, %v64_v52  ;;  %v195_v57 = vmul.f32 %v131_v51, %v1311_v53  ;;  %v134_v3 = vperm.slane %v104_v59, 0  ;;  %v107_v13 = vrot.slane %v51_v8, 1  ;;  %v74_v52 = vld [vmem:[#allocation5 + $0xa8] sm:$0xff]  ;;  %v76_v59 = vld [vmem:[#allocation5 + $0xb8] sm:$0xff] }
  0x1a   :  { %222 = vadd.xlane.f32.xlu0 %v221_v30  ;;  %v245_v60 = vsel %vm217_vm0, %v194_v54, 0.0  ;;  %v197_v9 = vmul.f32 %v133_v61, %v1316_v62  ;;  %v199_v11 = vmul.f32 %v135_v2, %v67_v4  ;;  %v136_v16 = vperm.slane %v106_v10, 0 }
  0x1b   :  { %v251_v63 = vsel %vm217_vm0, %v196_v56, 0.0  ;;  %v248_v0 = vsel %vm217_vm0, %v195_v57, 0.0  ;;  %v198_v12 = vmul.f32 %v134_v3, %v1320_v5  ;;  %v138_v22 = vperm.slane %v107_v13, 0 }
  0x1c   :  { %234 = vadd.xlane.f32.xlu2 %v233_v33  ;;  %228 = vadd.xlane.f32.xlu1 %v227_v34  ;;  %v254_v15 = vsel %vm217_vm0, %v197_v9, 0.0  ;;  %v260_v18 = vsel %vm217_vm0, %v199_v11, 0.0  ;;  %v137_v23 = vperm.slane %v51_v8, 0  ;;  %v200_v26 = vmul.f32 %v136_v16, %v68_v17  ;;  %v1334_v9 = vld [vmem:[#allocation5 + $0xc0] sm:$0xff]  ;;  %v79_v16 = vld [vmem:[#allocation5 + $0xd0] sm:$0xff] }
  0x1d   :  { %v257_v19 = vsel %vm217_vm0, %v198_v12, 0.0  ;;  %v108_v27 = vrot.slane %v51_v8, 2  ;;  %v202_v28 = vmul.f32 %v138_v22, %v70_v24  ;;  %v109_v30 = vrot.slane %v51_v8, 3 }
  0x1e   :  { %v201_v29 = vmul.f32 %v137_v23, %v69_v25  ;;  %v110_v31 = vrot.slane %v51_v8, 4  ;;  %v263_v33 = vsel %vm217_vm0, %v200_v26, 0.0  ;;  %v111_v44 = vrot.slane %v51_v8, 5 }
  0x1f   :  { %v139_v34 = vperm.slane %v108_v27, 0  ;;  %v269_v36 = vsel %vm217_vm0, %v202_v28, 0.0  ;;  %v140_v39 = vperm.slane %v109_v30, 0  ;;  %v80_v27 = vld [vmem:[#allocation5 + $0xd8] sm:$0xff]  ;;  %vm390_vm2 = vcmask 1042434  }
  0x20   :  { %v266_v37 = vsel %vm217_vm0, %v201_v29, 0.0  ;;  %v141_v40 = vperm.slane %v110_v31, 0  ;;  %v142_v51 = vperm.slane %v111_v44, 0  ;;  %vm392_vm3 = vcmask 1043459  }
  0x21   :  { %v203_v43 = vmul.f32 %v139_v34, %v71_v35  ;;  %v82_v34 = vld [vmem:[#allocation5 + $0xe8] sm:$0xff]  ;;  %vm394_vm4 = vcmask 1044484   ;;  %vm396_vm5 = vcmask 1045509   ;;  %vm398_vm6 = vcmask 1046534  }
  0x22   :  { %237 = vadd.xlane.f32.xlu0 %v236_v45  ;;  %v204_v45 = vmul.f32 %v140_v39, %v72_v41  ;;  %v205_v46 = vmul.f32 %v141_v40, %v73_v42  ;;  %v206_v61 = vmul.f32 %v142_v51, %v74_v52  ;;  %vm400_vm7 = vcmask 1047559  }
  0x23   :  { %v272_v50 = vsel %vm217_vm0, %v203_v43, 0.0  ;;  %v83_v43 = vld [vmem:[#allocation5 + $0xf0] sm:$0xff]  ;;  %vm431_vm9 = vcmask 64512  }
  0x24   :  { %243 = vadd.xlane.f32.xlu2 %v242_v48  ;;  %240 = vadd.xlane.f32.xlu1 %v239_v49  ;;  %v112_v48 = vrot.slane %v51_v8, 6  ;;  %v113_v49 = vrot.slane %v51_v8, 7  ;;  %v275_v54 = vsel %vm217_vm0, %v204_v45, 0.0  ;;  %v278_v55 = vsel %vm217_vm0, %v205_v46, 0.0 }
  0x25   :  { %v281_v4 = vsel %vm217_vm0, %v206_v61, 0.0 }
  0x26   :  { %v143_v56 = vperm.slane %v112_v48, 0  ;;  %v144_v57 = vperm.slane %v113_v49, 0  ;;  %v84_v48 = vld [vmem:[#allocation5 + $0xf8] sm:$0xff] }
  0x2a   :  { %246 = vadd.xlane.f32.xlu0 %v245_v60  ;;  %v52_v60 = vld [vmem:[#allocation2 + $0x18] sm:$0xff] }
  0x2b   :  { %v114_v2 = vrot.slane %v52_v60, 1  ;;  %v115_v3 = vrot.slane %v52_v60, 2  ;;  %v145_v8 = vperm.slane %v52_v60, 0  ;;  %v117_v23 = vrot.slane %v52_v60, 4 }
  0x2c   :  { %252 = vadd.xlane.f32.xlu2 %v251_v63  ;;  %249 = vadd.xlane.f32.xlu1 %v248_v0  ;;  %v207_v63 = vmul.f32 %v143_v56, %v75_v58  ;;  %v208_v0 = vmul.f32 %v144_v57, %v76_v59  ;;  %v118_v24 = vrot.slane %v52_v60, 5  ;;  %v120_v40 = vrot.slane %v52_v60, 7 }
  0x2d   :  { %v146_v12 = vperm.slane %v114_v2, 0  ;;  %v147_v13 = vperm.slane %v115_v3, 0  ;;  %v209_v17 = vmul.f32 %v145_v8, %v1334_v9  ;;  %v149_v30 = vperm.slane %v117_v23, 0 }
  0x2e   :  { %v284_v10 = vsel %vm217_vm0, %v207_v63, 0.0  ;;  %v287_v11 = vsel %vm217_vm0, %v208_v0, 0.0  ;;  %v150_v31 = vperm.slane %v118_v24, 0  ;;  %v152_v46 = vperm.slane %v120_v40, 0 }
  0x2f   :  { %v211_v22 = vmul.f32 %v147_v13, %v79_v16  ;;  %v290_v25 = vsel %vm217_vm0, %v209_v17, 0.0 }
  0x30   :  { %v214_v39 = vmul.f32 %v150_v31, %v82_v34 }
  0x31   :  { %v296_v29 = vsel %vm217_vm0, %v211_v22, 0.0 }
  0x32   :  { %255 = vadd.xlane.f32.xlu0 %v254_v15  ;;  %v78_v15 = vld [vmem:[#allocation5 + $0xc8] sm:$0xff]  ;;  %v305_v45 = vsel %vm217_vm0, %v214_v39, 0.0 }
  0x34   :  { %261 = vadd.xlane.f32.xlu2 %v260_v18  ;;  %258 = vadd.xlane.f32.xlu1 %v257_v19  ;;  %v116_v18 = vrot.slane %v52_v60, 3  ;;  %v210_v19 = vmul.f32 %v146_v12, %v78_v15 }
  0x36   :  { %v148_v26 = vperm.slane %v116_v18, 0  ;;  %v293_v28 = vsel %vm217_vm0, %v210_v19, 0.0 }
  0x38   :  { %v212_v35 = vmul.f32 %v148_v26, %v80_v27 }
  0x3a   :  { %264 = vadd.xlane.f32.xlu0 %v263_v33  ;;  %v81_v33 = vld [vmem:[#allocation5 + $0xe0] sm:$0xff]  ;;  %v299_v41 = vsel %vm217_vm0, %v212_v35, 0.0 }
  0x3c   :  { %270 = vadd.xlane.f32.xlu2 %v269_v36  ;;  %267 = vadd.xlane.f32.xlu1 %v266_v37  ;;  %v119_v36 = vrot.slane %v52_v60, 6  ;;  %v213_v37 = vmul.f32 %v149_v30, %v81_v33 }
  0x3e   :  { %v151_v42 = vperm.slane %v119_v36, 0  ;;  %v302_v44 = vsel %vm217_vm0, %v213_v37, 0.0 }
  0x40   :  { %v215_v49 = vmul.f32 %v151_v42, %v83_v43 }
  0x42   :  { %273 = vadd.xlane.f32.xlu0 %v272_v50  ;;  %v216_v50 = vmul.f32 %v152_v46, %v84_v48  ;;  %v308_v51 = vsel %vm217_vm0, %v215_v49, 0.0 }
  0x44   :  { %276 = vadd.xlane.f32.xlu1 %v275_v54  ;;  %279 = vadd.xlane.f32.xlu2 %v278_v55  ;;  %v311_v52 = vsel %vm217_vm0, %v216_v50, 0.0  ;;  %v354_v55 = vlaneseq }
  0x46   :  { %v1348_v58 = vand.u32 127, %v354_v55 }
  0x4a   :  { %282 = vadd.xlane.f32.xlu0 %v281_v4 }
  0x4c   :  { %285 = vadd.xlane.f32.xlu1 %v284_v10  ;;  %288 = vadd.xlane.f32.xlu2 %v287_v11  ;;  %v1359_v10 = vld [vmem:[%s1552_s2] sm:$0xff]  }
  0x4d   :  { %v1106_v16 = vunpack.c.0.s8 %v1359_v10  ;;  %v1107_v48 = vunpack.c.1.s8 %v1359_v10 }
  0x4f   :  { %vm318_vm8 = vcmp.ne.s32.totalorder %v1106_v16, 0  ;;  %vm319_vm10 = vcmp.ne.s32.totalorder %v1107_v48, 0 }
  0x52   :  { %291 = vadd.xlane.f32.xlu0 %v290_v25 }
  0x54   :  { %294 = vadd.xlane.f32.xlu1 %v293_v28  ;;  %297 = vadd.xlane.f32.xlu2 %v296_v29 }
  0x5a   :  { %300 = vadd.xlane.f32.xlu0 %v299_v41 }
  0x5c   :  { %303 = vadd.xlane.f32.xlu1 %v302_v44  ;;  %306 = vadd.xlane.f32.xlu2 %v305_v45 }
  0x62   :  { %309 = vadd.xlane.f32.xlu0 %v308_v51 }
  0x64   :  { %312 = vadd.xlane.f32.xlu1 %v311_v52 }
  0x85   :  { %v220_v54 = vpop.xlane.xlu0 %219 }
  0x86   :  { %v356_v60 = vperm.slane %v220_v54, %v1348_v58 }
  0x87   :  { %v232_v56 = vpop.xlane.xlu2 %231  ;;  %v226_v57 = vpop.xlane.xlu1 %225 }
  0x88   :  { %v358_v63 = vperm.slane %v226_v57, %v1348_v58  ;;  %v360_v11 = vperm.slane %v232_v56, %v1348_v58 }
  0x8d   :  { %v223_v59 = vpop.xlane.xlu0 %222 }
  0x8e   :  { %v357_v61 = vperm.slane %v223_v59, %v1348_v58 }
  0x8f   :  { %v235_v0 = vpop.xlane.xlu2 %234  ;;  %v229_v2 = vpop.xlane.xlu1 %228 }
  0x90   :  { %v389_v3 = vsel %vm388_vm1, %v357_v61, %v356_v60  ;;  %v359_v4 = vperm.slane %v229_v2, %v1348_v58  ;;  %v361_v13 = vperm.slane %v235_v0, %v1348_v58 }
  0x91   :  { %v391_v8 = vsel %vm390_vm2, %v358_v63, %v389_v3 }
  0x92   :  { %v393_v12 = vsel %vm392_vm3, %v359_v4, %v391_v8 }
  0x93   :  { %v395_v15 = vsel %vm394_vm4, %v360_v11, %v393_v12 }
  0x94   :  { %v397_v23 = vsel %vm396_vm5, %v361_v13, %v395_v15 }
  0x95   :  { %v238_v17 = vpop.xlane.xlu0 %237 }
  0x96   :  { %v362_v18 = vperm.slane %v238_v17, %v1348_v58 }
  0x97   :  { %v244_v19 = vpop.xlane.xlu2 %243  ;;  %v241_v22 = vpop.xlane.xlu1 %240 }
  0x98   :  { %v363_v24 = vperm.slane %v241_v22, %v1348_v58  ;;  %v399_v25 = vsel %vm398_vm6, %v362_v18, %v397_v23  ;;  %v364_v30 = vperm.slane %v244_v19, %v1348_v58  ;;  %v1110_v18 = vunpack.c.2.s8 %v1359_v10 }
  0x9a   :  { %v401_v26 = vsel %vm400_vm7, %v363_v24, %v399_v25  ;;  %vm320_vm11 = vcmp.ne.s32.totalorder %v1110_v18, 0 }
  0x9b   :  { %v1371_v27 = vsel %vm318_vm8, -inf, %v401_v26 }
  0x9c   :  { %v432_v28 = vsel %vm431_vm9, %v1371_v27, -inf }
  0x9d   :  { %433 = vmax.xlane.f32.xlu2 %v432_v28  ;;  %v247_v29 = vpop.xlane.xlu0 %246 }
  0x9e   :  { %v365_v31 = vperm.slane %v247_v29, %v1348_v58 }
  0x9f   :  { %v253_v33 = vpop.xlane.xlu2 %252  ;;  %v250_v34 = vpop.xlane.xlu1 %249 }
  0xa0   :  { %v366_v35 = vperm.slane %v250_v34, %v1348_v58  ;;  %v402_v36 = vsel %vm388_vm1, %v365_v31, %v364_v30  ;;  %v367_v37 = vperm.slane %v253_v33, %v1348_v58 }
  0xa2   :  { %v403_v39 = vsel %vm390_vm2, %v366_v35, %v402_v36 }
  0xa3   :  { %v404_v44 = vsel %vm392_vm3, %v367_v37, %v403_v39 }
  0xa5   :  { %v256_v40 = vpop.xlane.xlu0 %255 }
  0xa6   :  { %v368_v41 = vperm.slane %v256_v40, %v1348_v58 }
  0xa7   :  { %v262_v42 = vpop.xlane.xlu2 %261  ;;  %v259_v43 = vpop.xlane.xlu1 %258 }
  0xa8   :  { %v369_v45 = vperm.slane %v259_v43, %v1348_v58  ;;  %v405_v46 = vsel %vm394_vm4, %v368_v41, %v404_v44  ;;  %v370_v49 = vperm.slane %v262_v42, %v1348_v58 }
  0xaa   :  { %v406_v50 = vsel %vm396_vm5, %v369_v45, %v405_v46 }
  0xab   :  { %v407_v57 = vsel %vm398_vm6, %v370_v49, %v406_v50 }
  0xad   :  { %v265_v51 = vpop.xlane.xlu0 %264 }
  0xae   :  { %v371_v52 = vperm.slane %v265_v51, %v1348_v58 }
  0xaf   :  { %v271_v54 = vpop.xlane.xlu2 %270  ;;  %v268_v56 = vpop.xlane.xlu1 %267 }
  0xb0   :  { %v408_v59 = vsel %vm400_vm7, %v371_v52, %v407_v57  ;;  %v373_v63 = vperm.slane %v271_v54, %v1348_v58  ;;  %v372_v0 = vperm.slane %v268_v56, %v1348_v58  ;;  %v1111_v52 = vunpack.c.3.s8 %v1359_v10 }
  0xb1   :  { %v1391_v60 = vsel %vm319_vm10, -inf, %v408_v59 }
  0xb2   :  { %v435_v61 = vsel %vm431_vm9, %v1391_v60, -inf  ;;  %v409_v11 = vsel %vm388_vm1, %v373_v63, %v372_v0  ;;  %vm321_vm12 = vcmp.ne.s32.totalorder %v1111_v52, 0 }
  0xb3   :  { %436 = vmax.xlane.f32.xlu0 %v435_v61 }
  0xb5   :  { %v274_v2 = vpop.xlane.xlu0 %273 }
  0xb6   :  { %v374_v3 = vperm.slane %v274_v2, %v1348_v58 }
  0xb7   :  { %v277_v4 = vpop.xlane.xlu1 %276  ;;  %v280_v8 = vpop.xlane.xlu2 %279 }
  0xb8   :  { %v375_v12 = vperm.slane %v277_v4, %v1348_v58  ;;  %v410_v13 = vsel %vm390_vm2, %v374_v3, %v409_v11  ;;  %v376_v15 = vperm.slane %v280_v8, %v1348_v58 }
  0xba   :  { %v411_v16 = vsel %vm392_vm3, %v375_v12, %v410_v13 }
  0xbb   :  { %v412_v22 = vsel %vm394_vm4, %v376_v15, %v411_v16 }
  0xbd   :  { %v283_v17 = vpop.xlane.xlu0 %282 }
  0xbe   :  { %v377_v19 = vperm.slane %v283_v17, %v1348_v58 }
  0xbf   :  { %v286_v23 = vpop.xlane.xlu1 %285  ;;  %v289_v24 = vpop.xlane.xlu2 %288 }
  0xc0   :  { %v413_v25 = vsel %vm396_vm5, %v377_v19, %v412_v22  ;;  %v378_v26 = vperm.slane %v286_v23, %v1348_v58  ;;  %v379_v28 = vperm.slane %v289_v24, %v1348_v58 }
  0xc2   :  { %v414_v29 = vsel %vm398_vm6, %v378_v26, %v413_v25 }
  0xc3   :  { %v415_v30 = vsel %vm400_vm7, %v379_v28, %v414_v29  ;;  %v530_v29 = vshrl.u32 %v354_v55, 7 }
  0xc4   :  { %v429_v31 = vsel %vm320_vm11, -inf, %v415_v30 }
  0xc5   :  { %v292_v33 = vpop.xlane.xlu0 %291  ;;  %v438_v34 = vsel %vm431_vm9, %v429_v31, -inf  ;;  %1120 = vset.pattern.permute.xlu0 %v530_v29  ;;  %1119 = vset.pattern.permute.xlu2 %v530_v29 }
  0xc6   :  { %439 = vmax.xlane.f32.xlu1 %v438_v34  ;;  %v380_v37 = vperm.slane %v292_v33, %v1348_v58 }
  0xc7   :  { %v295_v35 = vpop.xlane.xlu1 %294  ;;  %v298_v36 = vpop.xlane.xlu2 %297  ;;  %1118 = vset.pattern.permute.xlu1 %v530_v29 }
  0xc8   :  { %v381_v39 = vperm.slane %v295_v35, %v1348_v58  ;;  %v382_v40 = vperm.slane %v298_v36, %v1348_v58 }
  0xca   :  { %v416_v41 = vsel %vm388_vm1, %v381_v39, %v380_v37 }
  0xcb   :  { %v417_v45 = vsel %vm390_vm2, %v382_v40, %v416_v41 }
  0xcd   :  { %v301_v42 = vpop.xlane.xlu0 %300 }
  0xce   :  { %v383_v43 = vperm.slane %v301_v42, %v1348_v58 }
  0xcf   :  { %v304_v44 = vpop.xlane.xlu1 %303  ;;  %v307_v48 = vpop.xlane.xlu2 %306 }
  0xd0   :  { %v384_v46 = vperm.slane %v304_v44, %v1348_v58  ;;  %v418_v49 = vsel %vm392_vm3, %v383_v43, %v417_v45  ;;  %v385_v50 = vperm.slane %v307_v48, %v1348_v58 }
  0xd2   :  { %v419_v51 = vsel %vm394_vm4, %v384_v46, %v418_v49 }
  0xd3   :  { %v420_v57 = vsel %vm396_vm5, %v385_v50, %v419_v51 }
  0xd5   :  { %v310_v54 = vpop.xlane.xlu0 %309 }
  0xd6   :  { %v386_v56 = vperm.slane %v310_v54, %v1348_v58 }
  0xd7   :  { %v313_v59 = vpop.xlane.xlu1 %312 }
  0xd8   :  { %v387_v61 = vperm.slane %v313_v59, %v1348_v58  ;;  %v421_v63 = vsel %vm398_vm6, %v386_v56, %v420_v57 }
  0xda   :  { %v422_v0 = vsel %vm400_vm7, %v387_v61, %v421_v63 }
  0xdb   :  { %v430_v2 = vsel %vm321_vm12, -inf, %v422_v0 }
  0xdc   :  { %v441_v3 = vsel %vm431_vm9, %v430_v2, -inf }
  0xdd   :  { %442 = vmax.xlane.f32.xlu2 %v441_v3 }
 0x110   :  { %v434_v4 = vpop.xlane.xlu2 %433 }
 0x111   :  { %v444_v10 = vsub.f32 %v1371_v27, %v434_v4 }
 0x113   :  { %v448_v8 = vmul.f32 1.442695, %v444_v10 }
 0x115   :  { %1121 = vpow2.f32 %v448_v8 }
 0x11b   :  { %v1122_v11 = vpop.eup %1121 }
 0x11c   :  { %v456_v12 = vsel %vm431_vm9, %v1122_v11, 0.0 }
 0x11d   :  { %457 = vadd.xlane.f32.xlu0 %v456_v12 }
 0x126   :  { %v437_v13 = vpop.xlane.xlu0 %436 }
 0x127   :  { %v445_v58 = vsub.f32 %v1391_v60, %v437_v13 }
 0x129   :  { %v450_v15 = vmul.f32 1.442695, %v445_v58 }
 0x12b   :  { %1123 = vpow2.f32 %v450_v15 }
 0x131   :  { %v1432_v16 = vpop.eup %1123 }
 0x132   :  { %v459_v17 = vsel %vm431_vm9, %v1432_v16, 0.0 }
 0x133   :  { %460 = vadd.xlane.f32.xlu1 %v459_v17 }
 0x139   :  { %v440_v18 = vpop.xlane.xlu1 %439 }
 0x13a   :  { %v446_v19 = vsub.f32 %v429_v31, %v440_v18 }
 0x13c   :  { %v452_v27 = vmul.f32 1.442695, %v446_v19 }
 0x13e   :  { %1125 = vpow2.f32 %v452_v27 }
 0x144   :  { %v1436_v22 = vpop.eup %1125 }
 0x145   :  { %v462_v23 = vsel %vm431_vm9, %v1436_v22, 0.0 }
 0x146   :  { %463 = vadd.xlane.f32.xlu2 %v462_v23 }
 0x150   :  { %v443_v24 = vpop.xlane.xlu2 %442 }
 0x151   :  { %v447_v60 = vsub.f32 %v430_v2, %v443_v24 }
 0x153   :  { %v454_v25 = vmul.f32 1.442695, %v447_v60 }
 0x155   :  { %1127 = vpow2.f32 %v454_v25 }
 0x15b   :  { %v1440_v26 = vpop.eup %1127 }
 0x15c   :  { %v465_v28 = vsel %vm431_vm9, %v1440_v26, 0.0 }
 0x15d   :  { %466 = vadd.xlane.f32.xlu0 %v465_v28 }
 0x190   :  { %v458_v30 = vpop.xlane.xlu0 %457 }
 0x191   :  { %1129 = vrcp.f32 %v458_v30  ;;  %v479_v35 = vand.u32 2147483648, %v458_v30  ;;  %v477_v37 = vand.u32 2147483647, %v458_v30  ;;  %vm473_vm14 = vweird.f32 %v458_v30 }
 0x193   :  { %v480_v40 = vor.u32 1.1754944e-38, %v479_v35  ;;  %vm478_vm8 = vcmp.eq.f32.partialorder %v477_v37, 8.507059e+37 }
 0x197   :  { %v1130_v31 = vpop.eup %1129 }
 0x198   :  { %v469_v33 = vmul.f32 %v1130_v31, %v458_v30  ;;  %vm474_vm13 = vweird.f32 %v1130_v31 }
 0x199   :  { %vm475_vm15 = vmor %vm473_vm14, %vm474_vm13 }
 0x19a   :  { %v470_v34 = vsub.f32 1.0, %v469_v33 }
 0x19c   :  { %v471_v36 = vmul.f32 %v1130_v31, %v470_v34 }
 0x19e   :  { %v472_v39 = vadd.f32 %v1130_v31, %v471_v36 }
 0x1a0   :  { %v476_v41 = vsel %vm475_vm15, %v1130_v31, %v472_v39 }
 0x1a1   :  { %v481_v42 = vsel %vm478_vm8, %v480_v40, %v476_v41 }
 0x1a2   :  { %v524_v55 = vmul.f32 %v1122_v11, %v481_v42 }
 0x1a4   :  { %1076 = vst.msk [vmem:[%s1554_s4] sm:$0xff] %vm431_vm9, %v524_v55  ;;  %v542_v43 = vperm.slane %v524_v55, 2  ;;  %v535_v44 = vperm.slane %v524_v55, 1  ;;  %v528_v45 = vperm.slane %v524_v55, 0  ;;  %v549_v48 = vperm.slane %v524_v55, 3 }
 0x1a5   :  { %v556_v50 = vperm.slane %v524_v55, 4  ;;  %v563_v61 = vperm.slane %v524_v55, 5  ;;  %v570_v0 = vperm.slane %v524_v55, 6  ;;  %v577_v11 = vperm.slane %v524_v55, 7 }
 0x1a6   :  { %v461_v46 = vpop.xlane.xlu1 %460  ;;  %547 = vperm.xlu0 %1120, %v542_v43   ;;  %540 = vperm.xlu2 %1119, %v535_v44  }
 0x1a7   :  { %1131 = vrcp.f32 %v461_v46  ;;  %533 = vperm.xlu1 %1118, %v528_v45   ;;  %v493_v54 = vand.u32 2147483648, %v461_v46  ;;  %v491_v57 = vand.u32 2147483647, %v461_v46  ;;  %vm487_vm11 = vweird.f32 %v461_v46 }
 0x1a9   :  { %v494_v63 = vor.u32 1.1754944e-38, %v493_v54  ;;  %vm492_vm13 = vcmp.eq.f32.partialorder %v491_v57, 8.507059e+37 }
 0x1ad   :  { %v1132_v49 = vpop.eup %1131 }
 0x1ae   :  { %v483_v51 = vmul.f32 %v1132_v49, %v461_v46  ;;  %554 = vperm.xlu2 %1119, %v549_v48   ;;  %vm488_vm10 = vweird.f32 %v1132_v49 }
 0x1af   :  { %561 = vperm.xlu1 %1118, %v556_v50   ;;  %vm489_vm12 = vmor %vm487_vm11, %vm488_vm10 }
 0x1b0   :  { %v484_v52 = vsub.f32 1.0, %v483_v51 }
 0x1b2   :  { %v485_v56 = vmul.f32 %v1132_v49, %v484_v52 }
 0x1b4   :  { %v486_v59 = vadd.f32 %v1132_v49, %v485_v56 }
 0x1b6   :  { %v490_v2 = vsel %vm489_vm12, %v1132_v49, %v486_v59  ;;  %568 = vperm.xlu2 %1119, %v563_v61  }
 0x1b7   :  { %v495_v3 = vsel %vm492_vm13, %v494_v63, %v490_v2  ;;  %575 = vperm.xlu1 %1118, %v570_v0  }
 0x1b8   :  { %v525_v4 = vmul.f32 %v1432_v16, %v495_v3 }
 0x1b9   :  { %v464_v10 = vpop.xlane.xlu2 %463 }
 0x1ba   :  { %1077 = vst.msk [vmem:[%s1554_s4 + $0x8] sm:$0xff] %vm431_vm9, %v525_v4  ;;  %1133 = vrcp.f32 %v464_v10  ;;  %v591_v8 = vperm.slane %v525_v4, 1  ;;  %v584_v12 = vperm.slane %v525_v4, 0  ;;  %v612_v17 = vperm.slane %v525_v4, 4 }
 0x1bb   :  { %v507_v18 = vand.u32 2147483648, %v464_v10  ;;  %v598_v19 = vperm.slane %v525_v4, 2  ;;  %v505_v27 = vand.u32 2147483647, %v464_v10  ;;  %v605_v23 = vperm.slane %v525_v4, 3 }
 0x1bc   :  { %596 = vperm.xlu0 %1120, %v591_v8   ;;  %vm501_vm15 = vweird.f32 %v464_v10  ;;  %v633_v30 = vperm.slane %v525_v4, 7  ;;  %v619_v31 = vperm.slane %v525_v4, 5  ;;  %v626_v33 = vperm.slane %v525_v4, 6 }
 0x1bd   :  { %v508_v60 = vor.u32 1.1754944e-38, %v507_v18  ;;  %vm506_vm10 = vcmp.eq.f32.partialorder %v505_v27, 8.507059e+37 }
 0x1be   :  { %582 = vperm.xlu2 %1119, %v577_v11  }
 0x1bf   :  { %589 = vperm.xlu1 %1118, %v584_v12  }
 0x1c0   :  { %v1134_v13 = vpop.eup %1133 }
 0x1c1   :  { %v497_v58 = vmul.f32 %v1134_v13, %v464_v10  ;;  %vm502_vm14 = vweird.f32 %v1134_v13 }
 0x1c2   :  { %vm503_vm8 = vmor %vm501_vm15, %vm502_vm14 }
 0x1c3   :  { %v498_v15 = vsub.f32 1.0, %v497_v58 }
 0x1c4   :  { %617 = vperm.xlu0 %1120, %v612_v17  }
 0x1c5   :  { %v499_v16 = vmul.f32 %v1134_v13, %v498_v15 }
 0x1c6   :  { %603 = vperm.xlu2 %1119, %v598_v19  }
 0x1c7   :  { %v500_v24 = vadd.f32 %v1134_v13, %v499_v16  ;;  %610 = vperm.xlu1 %1118, %v605_v23  }
 0x1c9   :  { %v504_v25 = vsel %vm503_vm8, %v1134_v13, %v500_v24 }
 0x1ca   :  { %v509_v28 = vsel %vm506_vm10, %v508_v60, %v504_v25 }
 0x1cb   :  { %v526_v29 = vmul.f32 %v1436_v22, %v509_v28 }
 0x1cc   :  { %638 = vperm.xlu0 %1120, %v633_v30  }
 0x1cd   :  { %1078 = vst.msk [vmem:[%s1554_s4 + $0x10] sm:$0xff] %vm431_vm9, %v526_v29  ;;  %v654_v35 = vperm.slane %v526_v29, 2  ;;  %v640_v36 = vperm.slane %v526_v29, 0  ;;  %v647_v37 = vperm.slane %v526_v29, 1  ;;  %v675_v42 = vperm.slane %v526_v29, 5 }
 0x1ce   :  { %624 = vperm.xlu2 %1119, %v619_v31   ;;  %v661_v44 = vperm.slane %v526_v29, 3  ;;  %v668_v45 = vperm.slane %v526_v29, 4  ;;  %v689_v63 = vperm.slane %v526_v29, 7  ;;  %v682_v0 = vperm.slane %v526_v29, 6 }
 0x1cf   :  { %631 = vperm.xlu1 %1118, %v626_v33  }
 0x1d0   :  { %v467_v34 = vpop.xlane.xlu0 %466 }
 0x1d1   :  { %1135 = vrcp.f32 %v467_v34  ;;  %v521_v41 = vand.u32 2147483648, %v467_v34  ;;  %v519_v43 = vand.u32 2147483647, %v467_v34  ;;  %vm515_vm12 = vweird.f32 %v467_v34 }
 0x1d3   :  { %v522_v48 = vor.u32 1.1754944e-38, %v521_v41  ;;  %vm520_vm14 = vcmp.eq.f32.partialorder %v519_v43, 8.507059e+37 }
 0x1d4   :  { %659 = vperm.xlu0 %1120, %v654_v35  }
 0x1d6   :  { %645 = vperm.xlu2 %1119, %v640_v36  }
 0x1d7   :  { %v1136_v39 = vpop.eup %1135  ;;  %652 = vperm.xlu1 %1118, %v647_v37  }
 0x1d8   :  { %v511_v22 = vmul.f32 %v1136_v39, %v467_v34  ;;  %vm516_vm11 = vweird.f32 %v1136_v39 }
 0x1d9   :  { %vm517_vm13 = vmor %vm515_vm12, %vm516_vm11 }
 0x1da   :  { %v512_v40 = vsub.f32 1.0, %v511_v22 }
 0x1dc   :  { %v513_v55 = vmul.f32 %v1136_v39, %v512_v40  ;;  %680 = vperm.xlu0 %1120, %v675_v42  }
 0x1de   :  { %v514_v46 = vadd.f32 %v1136_v39, %v513_v55  ;;  %666 = vperm.xlu2 %1119, %v661_v44  }
 0x1df   :  { %673 = vperm.xlu1 %1118, %v668_v45  }
 0x1e0   :  { %v518_v49 = vsel %vm517_vm13, %v1136_v39, %v514_v46 }
 0x1e1   :  { %v523_v50 = vsel %vm520_vm14, %v522_v48, %v518_v49 }
 0x1e2   :  { %v527_v51 = vmul.f32 %v1440_v26, %v523_v50 }
 0x1e4   :  { %1079 = vst.msk [vmem:[%s1554_s4 + $0x18] sm:$0xff] %vm431_vm9, %v527_v51  ;;  %v710_v52 = vperm.slane %v527_v51, 2  ;;  %v703_v54 = vperm.slane %v527_v51, 1  ;;  %v696_v56 = vperm.slane %v527_v51, 0  ;;  %v731_v57 = vperm.slane %v527_v51, 5  ;;  %s1238_s4 = smov [#allocation7]  }
 0x1e5   :  { %v717_v59 = vperm.slane %v527_v51, 3  ;;  %v724_v61 = vperm.slane %v527_v51, 4  ;;  %v738_v26 = vperm.slane %v527_v51, 6  ;;  %v745_v2 = vperm.slane %v527_v51, 7  ;;  %s1084_s8 = sshll.u32 %s1238_s4, 4  ;;  %s1085_s8 = int_to_ptr.vmem [resolvable:$true] %s1084_s8 }
 0x1e6   :  { %715 = vperm.xlu0 %1120, %v710_v52   ;;  %701 = vperm.xlu2 %1119, %v696_v56  }
 0x1e7   :  { %708 = vperm.xlu1 %1118, %v703_v54  }
 0x1ee   :  { %736 = vperm.xlu0 %1120, %v731_v57   ;;  %722 = vperm.xlu2 %1119, %v717_v59  }
 0x1ef   :  { %729 = vperm.xlu1 %1118, %v724_v61  }
 0x1f6   :  { %694 = vperm.xlu0 %1120, %v689_v63   ;;  %687 = vperm.xlu2 %1119, %v682_v0  }
 0x1f7   :  { %743 = vperm.xlu1 %1118, %v738_v26  }
 0x1fe   :  { %750 = vperm.xlu2 %1119, %v745_v2  }
 0x200   :  { %v541_v3 = vpop.permute.xlu2 %540 }
 0x201   :  { %v753_v8 = vmul.f32 %v541_v3, %v1283_v14 }
 0x203   :  { %v791_v11 = vsel %vm217_vm0, %v753_v8, 0.0 }
 0x204   :  { %v792_v13 = vrot.slane %v791_v11, 4 }
 0x206   :  { %v793_v24 = vadd.f32 %v792_v13, %v791_v11 }
 0x208   :  { %v555_v4 = vpop.permute.xlu2 %554  ;;  %v794_v31 = vrot.slane %v793_v24, 2 }
 0x209   :  { %v755_v12 = vmul.f32 %v555_v4, %v1290_v21 }
 0x20a   :  { %v795_v40 = vadd.f32 %v794_v31, %v793_v24 }
 0x20b   :  { %v805_v16 = vsel %vm217_vm0, %v755_v12, 0.0 }
 0x20c   :  { %v806_v28 = vrot.slane %v805_v16, 4  ;;  %v796_v48 = vrot.slane %v795_v40, 1 }
 0x20e   :  { %v807_v36 = vadd.f32 %v806_v28, %v805_v16  ;;  %v797_v0 = vadd.f32 %v796_v48, %v795_v40 }
 0x210   :  { %v569_v10 = vpop.permute.xlu2 %568  ;;  %v808_v43 = vrot.slane %v807_v36, 2 }
 0x211   :  { %v757_v27 = vmul.f32 %v569_v10, %v1288_v20 }
 0x213   :  { %v819_v30 = vsel %vm217_vm0, %v757_v27, 0.0 }
 0x214   :  { %v820_v37 = vrot.slane %v819_v30, 4 }
 0x216   :  { %v821_v44 = vadd.f32 %v820_v37, %v819_v30 }
 0x218   :  { %v583_v58 = vpop.permute.xlu2 %582  ;;  %v548_v15 = vpop.permute.xlu0 %547  ;;  %v822_v57 = vrot.slane %v821_v44, 2 }
 0x219   :  { %v534_v17 = vpop.permute.xlu1 %533  ;;  %v754_v18 = vmul.f32 %v548_v15, %v1280_v7  ;;  %v759_v21 = vmul.f32 %v583_v58, %v1302_v38 }
 0x21a   :  { %v752_v19 = vmul.f32 %v534_v17, %v1276_v1  ;;  %v823_v12 = vadd.f32 %v822_v57, %v821_v44 }
 0x21b   :  { %v798_v23 = vsel %vm217_vm0, %v754_v18, 0.0  ;;  %v833_v33 = vsel %vm217_vm0, %v759_v21, 0.0  ;;  %v1137_v21 = vld [vmem:[#allocation5 + $0x40] sm:$0xff] }
 0x21c   :  { %v784_v14 = vsel %vm217_vm0, %v752_v19, 0.0  ;;  %v799_v60 = vrot.slane %v798_v23, 4  ;;  %v834_v38 = vrot.slane %v833_v33, 4 }
 0x21d   :  { %v785_v25 = vrot.slane %v784_v14, 4 }
 0x21e   :  { %v800_v29 = vadd.f32 %v799_v60, %v798_v23  ;;  %v835_v49 = vadd.f32 %v834_v38, %v833_v33 }
 0x21f   :  { %v786_v7 = vadd.f32 %v785_v25, %v784_v14  ;;  %v824_v14 = vrot.slane %v823_v12, 1 }
 0x220   :  { %v604_v1 = vpop.permute.xlu2 %603  ;;  %v801_v20 = vrot.slane %v800_v29, 2  ;;  %v836_v26 = vrot.slane %v835_v49, 2 }
 0x221   :  { %v787_v34 = vrot.slane %v786_v7, 2  ;;  %v562_v35 = vpop.permute.xlu1 %561  ;;  %v762_v52 = vmul.f32 %v604_v1, %v1311_v53 }
 0x222   :  { %v756_v39 = vmul.f32 %v562_v35, %v1278_v6  ;;  %v802_v42 = vadd.f32 %v801_v20, %v800_v29  ;;  %v809_v6 = vadd.f32 %v808_v43, %v807_v36  ;;  %v837_v15 = vadd.f32 %v836_v26, %v835_v49 }
 0x223   :  { %v788_v22 = vadd.f32 %v787_v34, %v786_v7  ;;  %v854_v4 = vsel %vm217_vm0, %v762_v52, 0.0  ;;  %v825_v36 = vadd.f32 %v824_v14, %v823_v12 }
 0x224   :  { %v812_v41 = vsel %vm217_vm0, %v756_v39, 0.0  ;;  %v803_v51 = vrot.slane %v802_v42, 1  ;;  %v810_v11 = vrot.slane %v809_v6, 1  ;;  %v855_v17 = vrot.slane %v854_v4, 4 }
 0x225   :  { %v813_v55 = vrot.slane %v812_v41, 4  ;;  %v789_v45 = vrot.slane %v788_v22, 1  ;;  %v838_v7 = vrot.slane %v837_v15, 1 }
 0x226   :  { %v804_v3 = vadd.f32 %v803_v51, %v802_v42  ;;  %v811_v24 = vadd.f32 %v810_v11, %v809_v6  ;;  %v856_v31 = vadd.f32 %v855_v17, %v854_v4 }
 0x227   :  { %v814_v46 = vadd.f32 %v813_v55, %v812_v41  ;;  %v790_v59 = vadd.f32 %v789_v45, %v788_v22 }
 0x228   :  { %v625_v50 = vpop.permute.xlu2 %624  ;;  %v857_v43 = vrot.slane %v856_v31, 2 }
 0x229   :  { %v815_v54 = vrot.slane %v814_v46, 2  ;;  %v576_v56 = vpop.permute.xlu1 %575  ;;  %v1040_v53 = vsel %vm388_vm1, %v797_v0, %v790_v59  ;;  %v765_v28 = vmul.f32 %v625_v50, %v1320_v5  ;;  %v839_v5 = vadd.f32 %v838_v7, %v837_v15  ;;  %v1138_v50 = vld [vmem:[#allocation5 + $0x58] sm:$0xff] }
 0x22a   :  { %v758_v61 = vmul.f32 %v576_v56, %v1298_v32  ;;  %v1041_v19 = vsel %vm390_vm2, %v804_v3, %v1040_v53  ;;  %v858_v57 = vadd.f32 %v857_v43, %v856_v31 }
 0x22b   :  { %v816_v63 = vadd.f32 %v815_v54, %v814_v46  ;;  %v875_v37 = vsel %vm217_vm0, %v765_v28, 0.0 }
 0x22c   :  { %v826_v2 = vsel %vm217_vm0, %v758_v61, 0.0  ;;  %v876_v48 = vrot.slane %v875_v37, 4  ;;  %v859_v12 = vrot.slane %v858_v57, 1 }
 0x22d   :  { %v817_v10 = vrot.slane %v816_v63, 1  ;;  %v827_v8 = vrot.slane %v826_v2, 4 }
 0x22e   :  { %v597_v58 = vpop.permute.xlu0 %596 }
 0x22f   :  { %v828_v13 = vadd.f32 %v827_v8, %v826_v2  ;;  %v761_v32 = vmul.f32 %v597_v58, %v1307_v47  ;;  %v818_v16 = vadd.f32 %v817_v10, %v816_v63  ;;  %v1042_v47 = vsel %vm392_vm3, %v811_v24, %v1041_v19  ;;  %v1139_v10 = vld [vmem:[#allocation5 + $0x78] sm:$0xff] }
 0x230   :  { %v1484_v18 = vpop.permute.xlu2 %645  ;;  %v877_v63 = vadd.f32 %v876_v48, %v875_v37 }
 0x231   :  { %v829_v27 = vrot.slane %v828_v13, 2  ;;  %v590_v23 = vpop.permute.xlu1 %589  ;;  %v847_v60 = vsel %vm217_vm0, %v761_v32, 0.0  ;;  %v1043_v33 = vsel %vm394_vm4, %v818_v16, %v1042_v47  ;;  %v1140_v32 = vld [vmem:[#allocation5 + $0x70] sm:$0xff]  ;;  %v1142_v47 = vld [vmem:[#allocation5 + $0x98] sm:$0xff] }
 0x232   :  { %v760_v25 = vmul.f32 %v1137_v21, %v590_v23  ;;  %v848_v30 = vrot.slane %v847_v60, 4  ;;  %v1044_v38 = vsel %vm396_vm5, %v825_v36, %v1043_v33  ;;  %v878_v58 = vrot.slane %v877_v63, 2 }
 0x233   :  { %v830_v29 = vadd.f32 %v829_v27, %v828_v13 }
 0x234   :  { %v840_v1 = vsel %vm217_vm0, %v760_v25, 0.0  ;;  %v849_v20 = vadd.f32 %v848_v30, %v847_v60  ;;  %v860_v60 = vadd.f32 %v859_v12, %v858_v57  ;;  %v1141_v30 = vld [vmem:[#allocation5 + $0x80] sm:$0xff] }
 0x235   :  { %v831_v34 = vrot.slane %v830_v29, 1  ;;  %v841_v35 = vrot.slane %v840_v1, 4  ;;  %v768_v7 = vmul.f32 %v1141_v30, %v1484_v18  ;;  %v1145_v12 = vld [vmem:[#allocation5 + $0xa0] sm:$0xff] }
 0x236   :  { %v618_v40 = vpop.permute.xlu0 %617  ;;  %v850_v41 = vrot.slane %v849_v20, 2 }
 0x237   :  { %v832_v39 = vadd.f32 %v831_v34, %v830_v29  ;;  %v842_v22 = vadd.f32 %v841_v35, %v840_v1  ;;  %v764_v42 = vmul.f32 %v618_v40, %v1316_v62  ;;  %v879_v29 = vadd.f32 %v878_v58, %v877_v63 }
 0x238   :  { %v667_v55 = vpop.permute.xlu2 %666  ;;  %v851_v6 = vadd.f32 %v850_v41, %v849_v20  ;;  %v896_v41 = vsel %vm217_vm0, %v768_v7, 0.0 }
 0x239   :  { %v1045_v44 = vsel %vm398_vm6, %v832_v39, %v1044_v38  ;;  %v843_v45 = vrot.slane %v842_v22, 2  ;;  %v611_v46 = vpop.permute.xlu1 %610  ;;  %v868_v49 = vsel %vm217_vm0, %v764_v42, 0.0  ;;  %v771_v1 = vmul.f32 %v1142_v47, %v667_v55  ;;  %v1143_v42 = vld [vmem:[#allocation5 + $0x88] sm:$0xff] }
 0x23a   :  { %v763_v51 = vmul.f32 %v1138_v50, %v611_v46  ;;  %v1046_v52 = vsel %vm400_vm7, %v839_v5, %v1045_v44  ;;  %v869_v56 = vrot.slane %v868_v49, 4  ;;  %v852_v4 = vrot.slane %v851_v6, 1 }
 0x23b   :  { %v844_v54 = vadd.f32 %v843_v45, %v842_v22  ;;  %1072 = vst.msk [vmem:[#allocation7] sm:$0xff] %vm217_vm0, %v1046_v52  ;;  %v880_v38 = vrot.slane %v879_v29, 1  ;;  %v917_v55 = vsel %vm217_vm0, %v771_v1, 0.0  ;;  %v897_v50 = vrot.slane %v896_v41, 4 }
 0x23c   :  { %v861_v62 = vsel %vm217_vm0, %v763_v51, 0.0  ;;  %v870_v59 = vadd.f32 %v869_v56, %v868_v49  ;;  %v853_v24 = vadd.f32 %v852_v4, %v851_v6 }
 0x23d   :  { %v862_v61 = vrot.slane %v861_v62, 4  ;;  %v845_v0 = vrot.slane %v844_v54, 1  ;;  %v881_v6 = vadd.f32 %v880_v38, %v879_v29 }
 0x23e   :  { %v871_v26 = vrot.slane %v870_v59, 2  ;;  %v639_v3 = vpop.permute.xlu0 %638 }
 0x23f   :  { %v863_v2 = vadd.f32 %v862_v61, %v861_v62  ;;  %v767_v8 = vmul.f32 %v1139_v10, %v639_v3  ;;  %v846_v15 = vadd.f32 %v845_v0, %v844_v54  ;;  %v1144_v54 = vld [vmem:[#allocation5 + $0x90] sm:$0xff]  ;;  %v918_v62 = vrot.slane %v917_v55, 4 }
 0x240   :  { %v702_v11 = vpop.permute.xlu2 %701  ;;  %v872_v16 = vadd.f32 %v871_v26, %v870_v59 }
 0x241   :  { %v864_v53 = vrot.slane %v863_v2, 2  ;;  %v632_v13 = vpop.permute.xlu1 %631  ;;  %v889_v17 = vsel %vm217_vm0, %v767_v8, 0.0  ;;  %v1047_v31 = vsel %vm388_vm1, %v853_v24, %v846_v15  ;;  %v776_v46 = vmul.f32 %v702_v11, %v1334_v9 }
 0x242   :  { %v766_v19 = vmul.f32 %v1140_v32, %v632_v13  ;;  %v890_v23 = vrot.slane %v889_v17, 4  ;;  %v873_v33 = vrot.slane %v872_v16, 1  ;;  %v1048_v39 = vsel %vm390_vm2, %v860_v60, %v1047_v31 }
 0x243   :  { %v865_v27 = vadd.f32 %v864_v53, %v863_v2  ;;  %v952_v59 = vsel %vm217_vm0, %v776_v46, 0.0  ;;  %v898_v2 = vadd.f32 %v897_v50, %v896_v41  ;;  %v919_v8 = vadd.f32 %v918_v62, %v917_v55 }
 0x244   :  { %v882_v14 = vsel %vm217_vm0, %v766_v19, 0.0  ;;  %v891_v25 = vadd.f32 %v890_v23, %v889_v17  ;;  %v874_v44 = vadd.f32 %v873_v33, %v872_v16  ;;  %v953_v11 = vrot.slane %v952_v59, 4  ;;  %v1146_v19 = vld [vmem:[#allocation5 + $0xa8] sm:$0xff] }
 0x245   :  { %v866_v21 = vrot.slane %v865_v27, 1  ;;  %v883_v28 = vrot.slane %v882_v14, 4  ;;  %v899_v32 = vrot.slane %v898_v2, 2 }
 0x246   :  { %v892_v20 = vrot.slane %v891_v25, 2  ;;  %v660_v36 = vpop.permute.xlu0 %659  ;;  %v954_v23 = vadd.f32 %v953_v11, %v952_v59 }
 0x247   :  { %v867_v34 = vadd.f32 %v866_v21, %v865_v27  ;;  %v884_v35 = vadd.f32 %v883_v28, %v882_v14  ;;  %v770_v56 = vmul.f32 %v1144_v54, %v660_v36  ;;  %v920_v27 = vrot.slane %v919_v8, 2  ;;  %v1147_v14 = vld [vmem:[#allocation5 + $0xd8] sm:$0xff]  ;;  %v1150_v36 = vld [vmem:[#allocation5 + $0xd0] sm:$0xff] }
 0x248   :  { %v723_v37 = vpop.permute.xlu2 %722  ;;  %v893_v22 = vadd.f32 %v892_v20, %v891_v25  ;;  %v1148_v25 = vld [vmem:[#allocation5 + $0xb0] sm:$0xff]  ;;  %v900_v7 = vadd.f32 %v899_v32, %v898_v2  ;;  %v955_v33 = vrot.slane %v954_v23, 2 }
 0x249   :  { %v885_v40 = vrot.slane %v884_v35, 2  ;;  %v653_v5 = vpop.permute.xlu1 %652  ;;  %v1049_v18 = vsel %vm392_vm3, %v867_v34, %v1048_v39  ;;  %v910_v4 = vsel %vm217_vm0, %v770_v56, 0.0  ;;  %v779_v60 = vmul.f32 %v1147_v14, %v723_v37  ;;  %v1149_v34 = vld [vmem:[#allocation5 + $0xc8] sm:$0xff] }
 0x24a   :  { %v769_v43 = vmul.f32 %v1143_v42, %v653_v5  ;;  %v894_v48 = vrot.slane %v893_v22, 1  ;;  %v1050_v51 = vsel %vm394_vm4, %v874_v44, %v1049_v18  ;;  %v911_v15 = vrot.slane %v910_v4, 4  ;;  %v1151_v44 = vld [vmem:[#allocation5 + $0xf8] sm:$0xff] }
 0x24b   :  { %v886_v45 = vadd.f32 %v885_v40, %v884_v35  ;;  %v1051_v0 = vsel %vm396_vm5, %v881_v6, %v1050_v51  ;;  %v921_v1 = vadd.f32 %v920_v27, %v919_v8  ;;  %v973_v40 = vsel %vm217_vm0, %v779_v60, 0.0  ;;  %v1153_v8 = vld [vmem:[#allocation5 + $0xe0] sm:$0xff] }
 0x24c   :  { %v903_v49 = vsel %vm217_vm0, %v769_v43, 0.0  ;;  %v895_v63 = vadd.f32 %v894_v48, %v893_v22  ;;  %v912_v29 = vadd.f32 %v911_v15, %v910_v4  ;;  %v956_v46 = vadd.f32 %v955_v33, %v954_v23 }
 0x24d   :  { %v887_v52 = vrot.slane %v886_v45, 1  ;;  %v904_v61 = vrot.slane %v903_v49, 4  ;;  %v974_v48 = vrot.slane %v973_v40, 4  ;;  %v901_v56 = vrot.slane %v900_v7, 1 }
 0x24e   :  { %v681_v26 = vpop.permute.xlu0 %680  ;;  %v913_v38 = vrot.slane %v912_v29, 2  ;;  %v922_v6 = vrot.slane %v921_v1, 1 }
 0x24f   :  { %v888_v57 = vadd.f32 %v887_v52, %v886_v45  ;;  %v905_v58 = vadd.f32 %v904_v61, %v903_v49  ;;  %v773_v16 = vmul.f32 %v1146_v19, %v681_v26  ;;  %v975_v4 = vadd.f32 %v974_v48, %v973_v40  ;;  %v1154_v40 = vld [vmem:[#allocation5 + $0xb8] sm:$0xff] }
 0x250   :  { %v688_v9 = vpop.permute.xlu2 %687  ;;  %v914_v62 = vadd.f32 %v913_v38, %v912_v29  ;;  %v923_v14 = vadd.f32 %v922_v6, %v921_v1 }
 0x251   :  { %v1052_v3 = vsel %vm398_vm6, %v888_v57, %v1051_v0  ;;  %v674_v10 = vpop.permute.xlu1 %673  ;;  %v906_v24 = vrot.slane %v905_v58, 2  ;;  %v774_v28 = vmul.f32 %v1148_v25, %v688_v9  ;;  %v931_v31 = vsel %vm217_vm0, %v773_v16, 0.0  ;;  %v1152_v9 = vld [vmem:[#allocation5 + $0xe8] sm:$0xff] }
 0x252   :  { %v772_v53 = vmul.f32 %v1145_v12, %v674_v10  ;;  %v1053_v13 = vsel %vm400_vm7, %v895_v63, %v1052_v3  ;;  %v932_v41 = vrot.slane %v931_v31, 4  ;;  %v957_v3 = vrot.slane %v956_v46, 1 }
 0x253   :  { %1073 = vst.msk [vmem:[#allocation7 + $0x8] sm:$0xff] %vm217_vm0, %v1053_v13  ;;  %v907_v22 = vadd.f32 %v906_v24, %v905_v58  ;;  %v938_v5 = vsel %vm217_vm0, %v774_v28, 0.0  ;;  %v915_v15 = vrot.slane %v914_v62, 1  ;;  %v902_v16 = vadd.f32 %v901_v56, %v900_v7 }
 0x254   :  { %v924_v17 = vsel %vm217_vm0, %v772_v53, 0.0  ;;  %v939_v49 = vrot.slane %v938_v5, 4  ;;  %v933_v57 = vadd.f32 %v932_v41, %v931_v31  ;;  %v976_v60 = vrot.slane %v975_v4, 2  ;;  %v1155_v41 = vld [vmem:[#allocation5 + $0xf0] sm:$0xff] }
 0x255   :  { %v925_v21 = vrot.slane %v924_v17, 4  ;;  %v908_v50 = vrot.slane %v907_v22, 1  ;;  %v916_v33 = vadd.f32 %v915_v15, %v914_v62 }
 0x256   :  { %v940_v10 = vadd.f32 %v939_v49, %v938_v5  ;;  %v934_v27 = vrot.slane %v933_v57, 2  ;;  %v977_v5 = vadd.f32 %v976_v60, %v975_v4 }
 0x257   :  { %v926_v37 = vadd.f32 %v925_v21, %v924_v17  ;;  %v909_v12 = vadd.f32 %v908_v50, %v907_v22 }
 0x258   :  { %v716_v30 = vpop.permute.xlu0 %715  ;;  %v751_v35 = vpop.permute.xlu2 %750  ;;  %v978_v56 = vrot.slane %v977_v5, 1 }
 0x259   :  { %v709_v47 = vpop.permute.xlu1 %708  ;;  %v778_v39 = vmul.f32 %v1150_v36, %v716_v30  ;;  %v783_v55 = vmul.f32 %v1151_v44, %v751_v35  ;;  %v927_v51 = vrot.slane %v926_v37, 2  ;;  %v1054_v28 = vsel %vm388_vm1, %v909_v12, %v902_v16 }
 0x25a   :  { %v777_v20 = vmul.f32 %v1149_v34, %v709_v47  ;;  %v941_v30 = vrot.slane %v940_v10, 2  ;;  %v958_v47 = vadd.f32 %v957_v3, %v956_v46  ;;  %v935_v36 = vadd.f32 %v934_v27, %v933_v57 }
 0x25b   :  { %v966_v42 = vsel %vm217_vm0, %v778_v39, 0.0  ;;  %v1001_v63 = vsel %vm217_vm0, %v783_v55, 0.0  ;;  %v928_v53 = vadd.f32 %v927_v51, %v926_v37  ;;  %v1055_v1 = vsel %vm390_vm2, %v916_v33, %v1054_v28 }
 0x25c   :  { %v959_v18 = vsel %vm217_vm0, %v777_v20, 0.0  ;;  %v967_v45 = vrot.slane %v966_v42, 4  ;;  %v1002_v17 = vrot.slane %v1001_v63, 4  ;;  %v936_v50 = vrot.slane %v935_v36, 1 }
 0x25d   :  { %v960_v43 = vrot.slane %v959_v18, 4  ;;  %v929_v29 = vrot.slane %v928_v53, 1  ;;  %v1056_v57 = vsel %vm392_vm3, %v923_v14, %v1055_v1 }
 0x25e   :  { %v968_v54 = vadd.f32 %v967_v45, %v966_v42  ;;  %v1003_v34 = vadd.f32 %v1002_v17, %v1001_v63 }
 0x25f   :  { %v961_v52 = vadd.f32 %v960_v43, %v959_v18  ;;  %v930_v42 = vadd.f32 %v929_v29, %v928_v53  ;;  %v942_v43 = vadd.f32 %v941_v30, %v940_v10 }
 0x260   :  { %v737_v59 = vpop.permute.xlu0 %736  ;;  %v969_v0 = vrot.slane %v968_v54, 2  ;;  %v1004_v45 = vrot.slane %v1003_v34, 2 }
 0x261   :  { %v962_v61 = vrot.slane %v961_v52, 2  ;;  %v730_v26 = vpop.permute.xlu1 %729  ;;  %v781_v2 = vmul.f32 %v1152_v9, %v737_v59  ;;  %v943_v59 = vrot.slane %v942_v43, 1  ;;  %v1057_v63 = vsel %vm394_vm4, %v930_v42, %v1056_v57 }
 0x262   :  { %v780_v11 = vmul.f32 %v1153_v8, %v730_v26  ;;  %v970_v23 = vadd.f32 %v969_v0, %v968_v54  ;;  %v1005_v0 = vadd.f32 %v1004_v45, %v1003_v34  ;;  %v979_v8 = vadd.f32 %v978_v56, %v977_v5 }
 0x263   :  { %v963_v13 = vadd.f32 %v962_v61, %v961_v52  ;;  %v987_v58 = vsel %vm217_vm0, %v781_v2, 0.0  ;;  %v937_v2 = vadd.f32 %v936_v50, %v935_v36 }
 0x264   :  { %v980_v32 = vsel %vm217_vm0, %v780_v11, 0.0  ;;  %v988_v19 = vrot.slane %v987_v58, 4  ;;  %v971_v39 = vrot.slane %v970_v23, 1 }
 0x265   :  { %v981_v24 = vrot.slane %v980_v32, 4  ;;  %v964_v21 = vrot.slane %v963_v13, 1  ;;  %v1058_v12 = vsel %vm396_vm5, %v937_v2, %v1057_v63 }
 0x266   :  { %v989_v25 = vadd.f32 %v988_v19, %v987_v58  ;;  %v972_v51 = vadd.f32 %v971_v39, %v970_v23 }
 0x267   :  { %v982_v31 = vadd.f32 %v981_v24, %v980_v32  ;;  %v965_v38 = vadd.f32 %v964_v21, %v963_v13  ;;  %v1006_v13 = vrot.slane %v1005_v0, 1  ;;  %v944_v32 = vadd.f32 %v943_v59, %v942_v43 }
 0x268   :  { %v990_v20 = vrot.slane %v989_v25, 2  ;;  %v695_v35 = vpop.permute.xlu0 %694 }
 0x269   :  { %v983_v7 = vrot.slane %v982_v31, 2  ;;  %v744_v22 = vpop.permute.xlu1 %743  ;;  %v775_v37 = vmul.f32 %v1154_v40, %v695_v35  ;;  %v1061_v6 = vsel %vm388_vm1, %v965_v38, %v958_v47  ;;  %v1059_v23 = vsel %vm398_vm6, %v944_v32, %v1058_v12 }
 0x26a   :  { %v782_v18 = vmul.f32 %v1155_v41, %v744_v22  ;;  %v991_v46 = vadd.f32 %v990_v20, %v989_v25  ;;  %v1062_v3 = vsel %vm390_vm2, %v972_v51, %v1061_v6  ;;  %v1007_v14 = vadd.f32 %v1006_v13, %v1005_v0 }
 0x26b   :  { %v984_v44 = vadd.f32 %v983_v7, %v982_v31  ;;  %v945_v55 = vsel %vm217_vm0, %v775_v37, 0.0  ;;  %v1063_v58 = vsel %vm392_vm3, %v979_v8, %v1062_v3 }
 0x26c   :  { %v994_v48 = vsel %vm217_vm0, %v782_v18, 0.0  ;;  %v946_v49 = vrot.slane %v945_v55, 4  ;;  %v992_v26 = vrot.slane %v991_v46, 1 }
 0x26d   :  { %v985_v52 = vrot.slane %v984_v44, 1  ;;  %v995_v54 = vrot.slane %v994_v48, 4 }
 0x26e   :  { %v947_v62 = vadd.f32 %v946_v49, %v945_v55  ;;  %v993_v15 = vadd.f32 %v992_v26, %v991_v46 }
 0x26f   :  { %v996_v61 = vadd.f32 %v995_v54, %v994_v48  ;;  %v986_v4 = vadd.f32 %v985_v52, %v984_v44 }
 0x270   :  { %v948_v9 = vrot.slane %v947_v62, 2 }
 0x271   :  { %v997_v10 = vrot.slane %v996_v61, 2  ;;  %v1064_v19 = vsel %vm394_vm4, %v986_v4, %v1063_v58 }
 0x272   :  { %v949_v11 = vadd.f32 %v948_v9, %v947_v62  ;;  %v1065_v60 = vsel %vm396_vm5, %v993_v15, %v1064_v19 }
 0x273   :  { %v998_v53 = vadd.f32 %v997_v10, %v996_v61 }
 0x274   :  { %v950_v17 = vrot.slane %v949_v11, 1 }
 0x275   :  { %v999_v16 = vrot.slane %v998_v53, 1 }
 0x276   :  { %v951_v27 = vadd.f32 %v950_v17, %v949_v11 }
 0x277   :  { %v1000_v24 = vadd.f32 %v999_v16, %v998_v53 }
 0x278   :  { %v1060_v21 = vsel %vm400_vm7, %v951_v27, %v1059_v23 }
 0x279   :  { %v1066_v25 = vsel %vm398_vm6, %v1000_v24, %v1065_v60  ;;  %1074 = vst.msk [vmem:[#allocation7 + $0x10] sm:$0xff] %vm217_vm0, %v1060_v21 }
 0x27a   :  { %v1067_v28 = vsel %vm400_vm7, %v1007_v14, %v1066_v25 }
 0x27b   :  { %1075 = vst.msk [vmem:[#allocation7 + $0x18] sm:$0xff] %vm217_vm0, %v1067_v28 }
 0x27c   :  { %1092 = dma.vmem_to_hbm [thread:$0]  %s1085_s8, 512, %s1087_s11, [#allocation4], %s1235_s23, %s1235_s23, %s1236_s24  }
 0x27d   :  { %1232 = dma.done.wait [#allocation4], 512  }
 0x27e   :  { %1233 = vsyncadd [#allocation4], 4294966784 }
 0x27f   :  { %1101 = vsyncpa [#allocation3], 1 }
 0x280   :  { %1102 = vsyncpa [#allocation6], 1 }
 0x281   :  { %1103 = vsyncpa [#allocation4], 1 }

</bundles_post_ra>
